<compile_context>
chip_gen: v7x
topology: tpu7x:2x2x1
jax: 0.10.0
libtpu: 0.0.40
codegen_flags: <defaults>
</compile_context>

<pallas_src>
import jax
import jax.numpy as jnp
from jax.experimental import pallas as pl
from jax.experimental.pallas import tpu as pltpu

# Compatibility shim: newer jax exposes CompilerParams, older TPUCompilerParams.
_CompilerParams = getattr(pltpu, "CompilerParams", None) or getattr(
    pltpu, "TPUCompilerParams")


def _round_up(x, m):
    return ((x + m - 1) // m) * m


def _cdiv(a, b):
    return (a + b - 1) // b


def _vmem_cap_bytes():
    """Usable VMEM budget, per chip generation (safe fallback off-TPU)."""
    try:
        info_fn = getattr(pltpu, "get_tpu_info", None)
        if info_fn is not None:
            cap = int(info_fn().vmem_capacity_bytes)
            # ~96 MiB on v5e/v6e (128 MiB physical), ~48 MiB on v7x (64 MiB).
            return max(32 << 20, min(int(0.75 * cap), 100 << 20))
    except Exception:
        pass
    return 48 << 20   # unknown platform (e.g. interpret mode): v7x-safe cap


# ---------------------------------------------------------------------------
# Kernel
# ---------------------------------------------------------------------------
def _gaussian_kernel(x_ref, w_ref, b_ref, eps_ref,
                     miu_ref, sigma_ref, latent_ref):
    # One fused MXU matmul produces both heads: the packed weight tile is
    # (in_dim, 2*TN) = [W_mu_tile | W_logsigma_tile].  x is cast to bf16 here
    # (hidden under the elementwise chain) instead of in the wrapper.
    x = x_ref[...].astype(jnp.bfloat16)                       # (TB, in_dim)
    y = jnp.dot(x, w_ref[...],
                preferred_element_type=jnp.float32) + b_ref[...]   # (TB, 2*TN) f32

    tn = miu_ref.shape[1]                  # TN is a multiple of 128 -> lane-aligned split
    miu = y[:, :tn]
    sigma = jnp.exp(y[:, tn:])             # EUP
    latent = miu + sigma * eps_ref[...]    # reparameterization: eps ~ N(0, 1)

    miu_ref[...] = miu
    sigma_ref[...] = sigma
    latent_ref[...] = latent


# ---------------------------------------------------------------------------
# Planning + parameter packing (done once, outside the per-call forward path)
# ---------------------------------------------------------------------------
def _plan_out_tiles(in_dim, out_dim, vmem_cap):
    """Pick the out-dim tile TN (multiple of 128) and the number of tiles."""
    out_full = _round_up(out_dim, 128)
    w_bytes_full = in_dim * 2 * out_full * 2          # packed bf16 weight bytes
    if w_bytes_full <= vmem_cap // 4:
        return out_full, 1                            # fully VMEM-resident weight
    # Per-tile (double-buffered) weight budget ~ cap/4 -> tn <= cap/(32*in_dim).
    tn_cap = max(128, (vmem_cap // (32 * in_dim)) // 128 * 128)
    n_nt = _cdiv(out_full, tn_cap)
    tn = _round_up(_cdiv(out_full, n_nt), 128)        # balanced tiles
    return tn, _cdiv(out_full, tn)


def _plan_batch_tiles(B, in_dim, tn, n_nt, vmem_cap):
    """Pick the batch tile TB (multiple of 8, balanced) and tile count."""
    # Double-buffered per-row stream bytes: x(f32) + eps(f32) + 3 f32 outputs.
    row_bytes = 2 * (4 * in_dim + 16 * tn)
    w_bytes = (2 if n_nt > 1 else 1) * in_dim * 2 * tn * 2
    budget = max(vmem_cap - w_bytes - (4 << 20), 8 * row_bytes)
    tb_cap = min(1024, max(8, (budget // row_bytes) // 8 * 8))
    n_bt = _cdiv(max(B, 1), tb_cap)
    tb = _round_up(_cdiv(B, n_bt), 8)                 # balanced: padding < 8 rows/tile
    return tb, n_bt


def pack_gaussian_params(w_mu, b_mu, w_sig, b_sig, *, vmem_cap=None):
    """Pack the two linear heads once: per out-tile columns [mu_j | logsigma_j]."""
    in_dim, out_dim = w_mu.shape
    cap = _vmem_cap_bytes() if vmem_cap is None else vmem_cap
    tn, n_nt = _plan_out_tiles(in_dim, out_dim, cap)
    out_p = tn * n_nt

    def pad_cols(w):
        return jnp.pad(w, ((0, 0), (0, out_p - out_dim)))

    wm = pad_cols(w_mu).reshape(in_dim, n_nt, tn)
    ws = pad_cols(w_sig).reshape(in_dim, n_nt, tn)
    w_pack = jnp.concatenate([wm, ws], axis=-1).reshape(
        in_dim, n_nt * 2 * tn).astype(jnp.bfloat16)

    bm = jnp.pad(b_mu, (0, out_p - out_dim)).reshape(n_nt, tn)
    bs = jnp.pad(b_sig, (0, out_p - out_dim)).reshape(n_nt, tn)
    b_pack = jnp.concatenate([bm, bs], axis=-1).reshape(
        1, n_nt * 2 * tn).astype(jnp.float32)

    return dict(w_pack=w_pack, b_pack=b_pack, in_dim=in_dim, out_dim=out_dim,
                tn=tn, n_nt=n_nt, out_p=out_p, vmem_cap=cap)


# ---------------------------------------------------------------------------
# Forward
# ---------------------------------------------------------------------------
def gaussian_forward(x, params, key):
    """x: (B, in_dim) f32; params: pack_gaussian_params(...); key: PRNG key.

    Returns (miu, sigma, latent).  miu & sigma parameterize the Normal
    distribution (the torch Distribution object has no tensor equivalent);
    latent = miu + sigma * eps with eps ~ N(0, 1).
    """
    B, in_dim = x.shape
    assert in_dim == params["in_dim"]
    out_dim = params["out_dim"]
    tn, n_nt, out_p = params["tn"], params["n_nt"], params["out_p"]
    cap = params["vmem_cap"]

    tb, n_bt = _plan_batch_tiles(B, in_dim, tn, n_nt, cap)
    bp = tb * n_bt

    # f32 in; bf16 cast happens inside the kernel (no extra wrapper HBM pass).
    x_p = jnp.pad(x.astype(jnp.float32), ((0, bp - B), (0, 0)))
    # Reparameterization noise streamed into the kernel.  (On a real-TPU-only
    # build this could be drawn in-kernel via pltpu.prng_* to drop this HBM
    # read stream, but that path has no interpret-mode lowering.)
    eps = jax.random.normal(key, (bp, out_p), jnp.float32)

    if n_nt == 1:
        # Whole packed weight VMEM-resident; 1-D batch grid, widest lane-dense stores.
        grid = (n_bt,)
        x_map = lambda i: (i, 0)
        w_map = lambda i: (0, 0)
        out_map = lambda i: (i, 0)
        dims = ("parallel",)
    else:
        # Choose grid order by re-streamed HBM bytes.
        x_restream = n_nt * bp * in_dim * 4            # x f32 re-read per out tile
        w_restream = n_bt * in_dim * 2 * out_p * 2     # bf16 weights re-read per batch tile
        if x_restream >= w_restream:
            grid = (n_nt, n_bt)                        # weight tile resident across batch axis
            x_map = lambda j, i: (i, 0)
            w_map = lambda j, i: (0, j)
            out_map = lambda j, i: (i, j)
        else:
            grid = (n_bt, n_nt)                        # x tile resident across out axis
            x_map = lambda i, j: (i, 0)
            w_map = lambda i, j: (0, j)
            out_map = lambda i, j: (i, j)
        dims = ("parallel", "parallel")                # disjoint output blocks -> both legal

    out_sds = jax.ShapeDtypeStruct((bp, out_p), jnp.float32)
    out_spec = pl.BlockSpec((tb, tn), out_map)

    # VMEM budget: weight block (+double buffer if streamed) + x/eps/output streams.
    w_vmem = (2 if n_nt > 1 else 1) * in_dim * 2 * tn * 2
    stream_vmem = 2 * tb * (4 * in_dim + 16 * tn)
    vmem_limit = int(min(cap, max(w_vmem + stream_vmem + (4 << 20), 32 << 20)))

    miu, sigma, latent = pl.pallas_call(
        _gaussian_kernel,
        grid=grid,
        in_specs=[
            pl.BlockSpec((tb, in_dim), x_map),        # activations
            pl.BlockSpec((in_dim, 2 * tn), w_map),    # packed [W_mu | W_logsigma] tile
            pl.BlockSpec((1, 2 * tn), w_map),         # packed biases
            pl.BlockSpec((tb, tn), out_map),          # eps, streamed like the outputs
        ],
        out_specs=(out_spec, out_spec, out_spec),
        out_shape=(out_sds, out_sds, out_sds),
        compiler_params=_CompilerParams(
            dimension_semantics=dims,
            vmem_limit_bytes=vmem_limit,
        ),
    )(x_p, params["w_pack"], params["b_pack"], eps)

    # Slice the lane/sublane padding back off.
    return miu[:B, :out_dim], sigma[:B, :out_dim], latent[:B, :out_dim]


def init_linear(key, in_dim, out_dim):
    # Deterministic init mimicking nn.Linear: U(-1/sqrt(in_dim), 1/sqrt(in_dim)).
    kw, kb = jax.random.split(key)
    bound = 1.0 / jnp.sqrt(jnp.float32(in_dim))
    w = jax.random.uniform(kw, (in_dim, out_dim), jnp.float32, -bound, bound)
    b = jax.random.uniform(kb, (out_dim,), jnp.float32, -bound, bound)
    return w, b


if __name__ == "__main__":
    key = jax.random.PRNGKey(0)
    k_x, k_mu, k_sig, k_eps = jax.random.split(key, 4)

    B, in_dim, out_dim = 2, 32, 16
    x = jax.random.normal(k_x, (B, in_dim), jnp.float32)
    w_mu, b_mu = init_linear(k_mu, in_dim, out_dim)
    w_sig, b_sig = init_linear(k_sig, in_dim, out_dim)

    params = pack_gaussian_params(w_mu, b_mu, w_sig, b_sig)   # once, at "init"
    miu, sigma, latent = gaussian_forward(x, params, k_eps)
    jax.block_until_ready((miu, sigma, latent))

    # Reference in plain JAX, with the same bf16 casts the kernel uses for the
    # MXU inputs (element-wise math stays f32 in both).
    xb = x.astype(jnp.bfloat16).astype(jnp.float32)
    wmb = w_mu.astype(jnp.bfloat16).astype(jnp.float32)
    wsb = w_sig.astype(jnp.bfloat16).astype(jnp.float32)
    miu_ref = xb @ wmb + b_mu
    sigma_ref = jnp.exp(xb @ wsb + b_sig)

    # Re-derive the same padded eps the forward drew, to check latent exactly.
    tb, n_bt = _plan_batch_tiles(B, in_dim, params["tn"], params["n_nt"],
                                 params["vmem_cap"])
    eps_full = jax.random.normal(k_eps, (tb * n_bt, params["out_p"]), jnp.float32)
    latent_ref = miu_ref + sigma_ref * eps_full[:B, :out_dim]

    assert miu.shape == (B, out_dim)
    assert sigma.shape == (B, out_dim)
    assert latent.shape == (B, out_dim)
    assert jnp.allclose(miu, miu_ref, atol=1e-3, rtol=1e-3)
    assert jnp.allclose(sigma, sigma_ref, atol=1e-3, rtol=1e-3)
    assert jnp.allclose(latent, latent_ref, atol=1e-3, rtol=1e-3)
    # Sanity check on the implied standard-normal noise.
    eps_implied = (latent - miu_ref) / sigma_ref
    assert bool(jnp.all(jnp.isfinite(eps_implied)))
    assert bool(jnp.all(jnp.abs(eps_implied) < 8.0))

    print("KERNEL_OK")
</pallas_src>

<mosaic_0001>
module attributes {stable_mosaic.version = 11 : i64} {
  func.func @_gaussian_kernel(%arg0: i32, %arg1: memref<8x32xf32, #tpu.memory_space<vmem>>, %arg2: memref<32x256xbf16, #tpu.memory_space<vmem>>, %arg3: memref<1x256xf32, #tpu.memory_space<vmem>>, %arg4: memref<8x128xf32, #tpu.memory_space<vmem>>, %arg5: memref<8x128xf32, #tpu.memory_space<vmem>>, %arg6: memref<8x128xf32, #tpu.memory_space<vmem>>, %arg7: memref<8x128xf32, #tpu.memory_space<vmem>>) attributes {dimension_semantics = [#tpu.dimension_semantics<parallel>], iteration_bounds = array<i64: 1>, scalar_prefetch = 0 : i64, scratch_operands = 0 : i64, tpu.core_type = #tpu.core_type<tc>, window_params = [{transform_indices = @transform_0, window_bounds = array<i64: 8, 32>}, {pipeline_mode = #tpu.pipeline_mode<synchronous>, transform_indices = @transform_1, window_bounds = array<i64: 32, 256>}, {pipeline_mode = #tpu.pipeline_mode<synchronous>, transform_indices = @transform_2, window_bounds = array<i64: 1, 256>}, {transform_indices = @transform_3, window_bounds = array<i64: 8, 128>}, {transform_indices = @transform_4, window_bounds = array<i64: 8, 128>}, {transform_indices = @transform_5, window_bounds = array<i64: 8, 128>}, {transform_indices = @transform_6, window_bounds = array<i64: 8, 128>}]} {
    %c0 = arith.constant 0 : index
    %c0_0 = arith.constant 0 : index
    %0 = vector.load %arg1[%c0, %c0_0] : memref<8x32xf32, #tpu.memory_space<vmem>>, vector<8x32xf32>
    %1 = arith.truncf %0 : vector<8x32xf32> to vector<8x32xbf16>
    %c0_1 = arith.constant 0 : index
    %c0_2 = arith.constant 0 : index
    %2 = vector.load %arg2[%c0_1, %c0_2] : memref<32x256xbf16, #tpu.memory_space<vmem>>, vector<32x256xbf16>
    %cst = arith.constant dense<0.000000e+00> : vector<8x256xf32>
    %3 = tpu.matmul %1, %2, %cst {dimension_numbers = #tpu.dot_dimension_numbers<[1], [0], [0], [1], [0, 0, 1, 1], [], []>} : vector<8x32xbf16>, vector<32x256xbf16>, vector<8x256xf32> -> vector<8x256xf32>
    %c0_3 = arith.constant 0 : index
    %c0_4 = arith.constant 0 : index
    %4 = vector.load %arg3[%c0_3, %c0_4] : memref<1x256xf32, #tpu.memory_space<vmem>>, vector<1x256xf32>
    %5 = vector.broadcast %4 : vector<1x256xf32> to vector<8x256xf32>
    %6 = arith.addf %3, %5 : vector<8x256xf32>
    %7 = vector.extract_strided_slice %6 {offsets = [0, 0], sizes = [8, 128], strides = [1, 1]} : vector<8x256xf32> to vector<8x128xf32>
    %8 = vector.extract_strided_slice %6 {offsets = [0, 128], sizes = [8, 128], strides = [1, 1]} : vector<8x256xf32> to vector<8x128xf32>
    %9 = math.exp %8 : vector<8x128xf32>
    %c0_5 = arith.constant 0 : index
    %c0_6 = arith.constant 0 : index
    %10 = vector.load %arg4[%c0_5, %c0_6] : memref<8x128xf32, #tpu.memory_space<vmem>>, vector<8x128xf32>
    %11 = arith.mulf %9, %10 : vector<8x128xf32>
    %12 = arith.addf %7, %11 : vector<8x128xf32>
    %c0_7 = arith.constant 0 : index
    %c0_8 = arith.constant 0 : index
    %13 = vector.load %arg5[%c0_7, %c0_8] : memref<8x128xf32, #tpu.memory_space<vmem>>, vector<8x128xf32>
    tpu.vector_store %arg5[%c0_7, %c0_8], %7 {strides = array<i32>} : memref<8x128xf32, #tpu.memory_space<vmem>>, vector<8x128xf32>,
    %c0_9 = arith.constant 0 : index
    %c0_10 = arith.constant 0 : index
    %14 = vector.load %arg6[%c0_9, %c0_10] : memref<8x128xf32, #tpu.memory_space<vmem>>, vector<8x128xf32>
    tpu.vector_store %arg6[%c0_9, %c0_10], %9 {strides = array<i32>} : memref<8x128xf32, #tpu.memory_space<vmem>>, vector<8x128xf32>,
    %c0_11 = arith.constant 0 : index
    %c0_12 = arith.constant 0 : index
    %15 = vector.load %arg7[%c0_11, %c0_12] : memref<8x128xf32, #tpu.memory_space<vmem>>, vector<8x128xf32>
    tpu.vector_store %arg7[%c0_11, %c0_12], %12 {strides = array<i32>} : memref<8x128xf32, #tpu.memory_space<vmem>>, vector<8x128xf32>,
    return
  }
  func.func @transform_0(%arg0: i32) -> (i32, i32) {
    %c0_i32 = arith.constant 0 : i32
    %c0_i32_0 = arith.constant 0 : i32
    return %arg0, %c0_i32 : i32, i32
  }
  func.func @transform_1(%arg0: i32) -> (i32, i32) {
    %c0_i32 = arith.constant 0 : i32
    %c0_i32_0 = arith.constant 0 : i32
    %c0_i32_1 = arith.constant 0 : i32
    return %c0_i32, %c0_i32_0 : i32, i32
  }
  func.func @transform_2(%arg0: i32) -> (i32, i32) {
    %c0_i32 = arith.constant 0 : i32
    %c0_i32_0 = arith.constant 0 : i32
    %c0_i32_1 = arith.constant 0 : i32
    return %c0_i32, %c0_i32_0 : i32, i32
  }
  func.func @transform_3(%arg0: i32) -> (i32, i32) {
    %c0_i32 = arith.constant 0 : i32
    %c0_i32_0 = arith.constant 0 : i32
    return %arg0, %c0_i32 : i32, i32
  }
  func.func @transform_4(%arg0: i32) -> (i32, i32) {
    %c0_i32 = arith.constant 0 : i32
    %c0_i32_0 = arith.constant 0 : i32
    return %arg0, %c0_i32 : i32, i32
  }
  func.func @transform_5(%arg0: i32) -> (i32, i32) {
    %c0_i32 = arith.constant 0 : i32
    %c0_i32_0 = arith.constant 0 : i32
    return %arg0, %c0_i32 : i32, i32
  }
  func.func @transform_6(%arg0: i32) -> (i32, i32) {
    %c0_i32 = arith.constant 0 : i32
    %c0_i32_0 = arith.constant 0 : i32
    return %arg0, %c0_i32 : i32, i32
  }
}

</mosaic_0001>

<bundles_post_ra>
// kernel: tpu_custom_call.1
= control target key start
LH: loop header
LB: loop body
LE: loop exit
PB: predicated region body
PF: predicated region fallthrough
CT: control target
= control target key end

     0   :  { %12 = vsyncpa [#allocation3], 0  ;;  %s438_s0 = inlined_call_operand.hbm [shape: f32[8,32], index: 0, kind: input, shape index: {}]   ;;  %s439_s1 = inlined_call_operand.hbm [shape: bf16[32,256], index: 1, kind: input, shape index: {}]   ;;  %s440_s2 = inlined_call_operand.vmem [shape: f32[1,256], index: 2, kind: input, shape index: {}]   ;;  %s441_s3 = inlined_call_operand.vmem [shape: f32[8,128], index: 3, kind: input, shape index: {}]   ;;  %s442_s4 = inlined_call_operand.hbm [shape: f32[8,128], index: 4, kind: output, shape index: {0}]   ;;  %s443_s5 = inlined_call_operand.hbm [shape: f32[8,128], index: 5, kind: output, shape index: {1}]   ;;  %s444_s6 = inlined_call_operand.hbm [shape: f32[8,128], index: 6, kind: output, shape index: {2}]  }
   0x1   :  { %13 = vsyncpa [#allocation6], 0 }
   0x2   :  { %14 = vsyncpa [#allocation4], 0 }
   0x3   :  { %15 = vsyncpa [#allocation9], 0  ;;  %s322_s21 = smov [#allocation2]   ;;  %s323_s23 = smov [#allocation5]  }
   0x4   :  { %s22_s22 = sshll.u32 %s322_s21, 4  ;;  %s31_s24 = sshll.u32 %s323_s23, 4  ;;  %s23_s22 = int_to_ptr.vmem [resolvable:$true] %s22_s22  ;;  %s365_s24 = int_to_ptr.vmem [resolvable:$true] %s31_s24 }
   0x5   :  { %s204_s27 = scalar_lea.hbm %s438_s0, 128 }
   0x6   :  { %p205_p0 = scmp.ne.s32.totalorder %s438_s0, %s204_s27  ;;  %p208_p1 = scmp.lt.u32.totalorder %s204_s27, %s438_s0 }
   0x8   :  { %p210_p2 = pnand %p208_p1, %p205_p0 }
   0xa   :  { %213 = shalt.err (!%p210_p2)
}
   0xb   :  { %s214_s8 = scalar_lea.vmem %s23_s22, 128  ;;  %p219_p4 = scmp.lt.s32.totalorder %s23_s22, %s23_s22 }
   0xc   :  { %p215_p3 = scmp.ne.s32.totalorder %s23_s22, %s214_s8  ;;  %p220_p5 = scmp.lt.s32.totalorder %s214_s8, %s214_s8 }
   0xe   :  { %p221_p6 = por %p220_p5, %p219_p4 }
  0x10   :  { %p222_p7 = pnand %p221_p6, %p215_p3 }
  0x12   :  { %225 = shalt.err (!%p222_p7)
}
  0x13   :  { %25 = dma.hbm_to_vmem [thread:$0]  %s438_s0, 128, %s23_s22, [#allocation3]  }
  0x14   :  { %s226_s13 = scalar_lea.hbm %s439_s1, 512 }
  0x15   :  { %p227_p8 = scmp.ne.s32.totalorder %s439_s1, %s226_s13  ;;  %p230_p9 = scmp.lt.u32.totalorder %s226_s13, %s439_s1 }
  0x17   :  { %p232_p10 = pnand %p230_p9, %p227_p8 }
  0x19   :  { %235 = shalt.err (!%p232_p10)
}
  0x1a   :  { %s236_s18 = scalar_lea.vmem %s365_s24, 512  ;;  %p241_p12 = scmp.lt.s32.totalorder %s365_s24, %s365_s24 }
  0x1b   :  { %p237_p11 = scmp.ne.s32.totalorder %s365_s24, %s236_s18  ;;  %p242_p13 = scmp.lt.s32.totalorder %s236_s18, %s236_s18 }
  0x1d   :  { %p243_p0 = por %p242_p13, %p241_p12 }
  0x1f   :  { %p244_p1 = pnand %p243_p0, %p237_p11 }
  0x21   :  { %247 = shalt.err (!%p244_p1)
}
  0x22   :  { %s324_s0 = smov 128   ;;  %s325_s19 = smov 8  }
  0x23   :  { %37 = dma.hbm_to_vmem [thread:$0]  %s439_s1, 512, %s365_s24, [#allocation6], %s324_s0, %s324_s0, %s325_s19  }
  0x24   :  { %314 = dma.done.wait [#allocation3], 128  }
  0x25   :  { %315 = vsyncadd [#allocation3], 4294967168 }
  0x26   :  { %316 = dma.done.wait [#allocation6], 512  }
  0x27   :  { %317 = vsyncadd [#allocation6], 4294966784  ;;  %v326_v0 = vmov 0   ;;  %v196_v1 = vld [vmem:[#allocation5 + $0x4] ss:$8 sps:$4 sm:$0xff]   ;;  %v49_v5 = vld [vmem:[#allocation2] sm:$0xff]  ;;  %v57_v7 = vlaneseq }
  0x28   :  { %123 = vmatprep.mubr.bf16.mxu0 %v326_v0  ;;  %v198_v2 = vld [vmem:[#allocation5] ss:$8 sps:$4 sm:$0xff]   ;;  %91 = vmatprep.subr.bf16.mxu0 %v196_v1  ;;  %v199_v3 = vld [vmem:[#allocation5 + $0x14] ss:$8 sps:$4 sm:$0xff]   ;;  %v201_v4 = vld [vmem:[#allocation5 + $0x10] ss:$8 sps:$4 sm:$0xff]   ;;  %v50_v6 = vpack.c.bf16 %v49_v5, %v49_v5 }
  0x29   :  { %92 = vmatpush1.bf16.msra.mxu0 %v198_v2  ;;  %vm87_vm0 = vcmask 261120   ;;  %v58_v8 = vshrl.u32 %v57_v7, 7  ;;  %v55_v10 = vld [vmem:[%s440_s2] sm:$0x3]  ;;  %s327_s23 = smov [#allocation7]  }
  0x2a   :  { %93 = vmatprep.subr.bf16.mxu0 %v199_v3  ;;  %s146_s24 = sshll.u32 %s327_s23, 4  ;;  %s147_s24 = int_to_ptr.vmem [resolvable:$true] %s146_s24 }
  0x2b   :  { %v59_v9 = vsub.s32 0, %v58_v8  ;;  %v63_v11 = vsub.s32 1, %v58_v8  ;;  %s248_s25 = scalar_lea.vmem %s147_s24, 128  ;;  %p253_p3 = scmp.lt.s32.totalorder %s147_s24, %s147_s24 }
  0x2c   :  { %p249_p2 = scmp.ne.s32.totalorder %s147_s24, %s248_s25  ;;  %p254_p4 = scmp.lt.s32.totalorder %s248_s25, %s248_s25 }
  0x2d   :  { %94 = vmatpush1.bf16.msra.mxu0 %v201_v4  ;;  %v60_v12 = vrot.slane %v55_v10, %v59_v9  ;;  %v64_v13 = vrot.slane %v55_v10, %v63_v11 }
  0x2e   :  { %p255_p5 = por %p254_p4, %p253_p3 }
  0x30   :  { %187 = vmatmul.mubr.msk.bf16.vlgmr.msra.gmra.mrb[0].mxu0 %vm87_vm0, %v50_v6  ;;  %p256_p6 = pnand %p255_p5, %p249_p2 }
 0x103   :  { %v125_v14 = vpop.f32.mrb[0].mxu0 }
 0x104   :  { %v126_v15 = vadd.f32 %v125_v14, %v60_v12  ;;  %v127_v16 = vpop.f32.mrb[1].mxu0 }
 0x105   :  { %v128_v17 = vadd.f32 %v127_v16, %v64_v13  ;;  %v129_v18 = vpop.f32.mrb[2].mxu0 }
 0x106   :  { %137 = vst [vmem:[#allocation7] sm:$0xff] %v126_v15  ;;  %v130_v19 = vpop.f32.mrb[3].mxu0 }
 0x107   :  { %v132_v20 = vmul.f32 1.442695, %v128_v17 }
 0x108   :  { %259 = shalt.err (!%p256_p6)
}
 0x109   :  { %s260_s27 = scalar_lea.hbm %s442_s4, 128 }
 0x10a   :  { %p261_p7 = scmp.ne.s32.totalorder %s442_s4, %s260_s27  ;;  %p264_p8 = scmp.lt.u32.totalorder %s260_s27, %s442_s4 }
 0x10c   :  { %p266_p9 = pnand %p264_p8, %p261_p7 }
 0x10e   :  { %269 = shalt.err (!%p266_p9)
}
 0x10f   :  { %149 = dma.vmem_to_hbm [thread:$0]  %s147_s24, 128, %s442_s4, [#allocation4]   ;;  %202 = vpow2.f32 %v132_v20  ;;  %v134_v21 = vld [vmem:[%s441_s3] sm:$0xff] }
 0x110   :  { %s328_s10 = smov [#allocation8]   ;;  %s329_s14 = smov [#allocation10]  }
 0x111   :  { %s156_s11 = sshll.u32 %s328_s10, 4  ;;  %s166_s15 = sshll.u32 %s329_s14, 4  ;;  %s157_s11 = int_to_ptr.vmem [resolvable:$true] %s156_s11  ;;  %s167_s15 = int_to_ptr.vmem [resolvable:$true] %s166_s15 }
 0x112   :  { %s270_s16 = scalar_lea.vmem %s157_s11, 128  ;;  %p275_p11 = scmp.lt.s32.totalorder %s157_s11, %s157_s11 }
 0x113   :  { %p271_p10 = scmp.ne.s32.totalorder %s157_s11, %s270_s16  ;;  %p276_p12 = scmp.lt.s32.totalorder %s270_s16, %s270_s16 }
 0x115   :  { %p277_p13 = por %p276_p12, %p275_p11 }
 0x117   :  { %p278_p0 = pnand %p277_p13, %p271_p10 }
 0x119   :  { %v203_v22 = vpop.eup %202 }
 0x11a   :  { %138 = vst [vmem:[#allocation8] sm:$0xff] %v203_v22  ;;  %v135_v23 = vmul.f32 %v203_v22, %v134_v21 }
 0x11b   :  { %281 = shalt.err (!%p278_p0)
}
 0x11c   :  { %s282_s18 = scalar_lea.hbm %s443_s5, 128 }
 0x11d   :  { %p283_p1 = scmp.ne.s32.totalorder %s443_s5, %s282_s18  ;;  %p286_p2 = scmp.lt.u32.totalorder %s282_s18, %s443_s5 }
 0x11f   :  { %p288_p3 = pnand %p286_p2, %p283_p1 }
 0x121   :  { %291 = shalt.err (!%p288_p3)
}
 0x122   :  { %159 = dma.vmem_to_hbm [thread:$0]  %s157_s11, 128, %s443_s5, [#allocation9]   ;;  %v136_v24 = vadd.f32 %v135_v23, %v126_v15 }
 0x123   :  { %s292_s22 = scalar_lea.vmem %s167_s15, 128  ;;  %p297_p5 = scmp.lt.s32.totalorder %s167_s15, %s167_s15 }
 0x124   :  { %139 = vst [vmem:[#allocation10] sm:$0xff] %v136_v24  ;;  %p293_p4 = scmp.ne.s32.totalorder %s167_s15, %s292_s22  ;;  %p298_p6 = scmp.lt.s32.totalorder %s292_s22, %s292_s22 }
 0x126   :  { %p299_p7 = por %p298_p6, %p297_p5 }
 0x128   :  { %p300_p8 = pnand %p299_p7, %p293_p4 }
 0x12a   :  { %303 = shalt.err (!%p300_p8)
}
 0x12b   :  { %s304_s25 = scalar_lea.hbm %s444_s6, 128 }
 0x12c   :  { %p305_p9 = scmp.ne.s32.totalorder %s444_s6, %s304_s25  ;;  %p308_p10 = scmp.lt.u32.totalorder %s304_s25, %s444_s6 }
 0x12e   :  { %p310_p11 = pnand %p308_p10, %p305_p9 }
 0x130   :  { %313 = shalt.err (!%p310_p11)
}
 0x131   :  { %169 = dma.vmem_to_hbm [thread:$0]  %s167_s15, 128, %s444_s6, [#allocation9]  }
 0x132   :  { %318 = dma.done.wait [#allocation4], 128  }
 0x133   :  { %319 = vsyncadd [#allocation4], 4294967168 }
 0x134   :  { %320 = dma.done.wait [#allocation9], 256  }
 0x135   :  { %321 = vsyncadd [#allocation9], 4294967040 }
 0x136   :  { %179 = vsyncpa [#allocation3], 1 }
 0x137   :  { %180 = vsyncpa [#allocation6], 1 }
 0x138   :  { %181 = vsyncpa [#allocation4], 1 }
 0x139   :  { %182 = vsyncpa [#allocation9], 1 }

</bundles_post_ra>
